<compile_context>
chip_gen: v6e
topology: v6e:2x2x1
jax: 0.10.0
libtpu: 0.0.40
codegen_flags: <defaults>
</compile_context>

<pallas_src>
import jax
import jax.numpy as jnp
from jax import lax
from jax.experimental import pallas as pl
from jax.experimental.pallas import tpu as pltpu

HW = 28                    # image height == width
K = 3                      # conv kernel size
NPIX = HW * HW             # 784 flattened pixels
NPAD = 7 * 128             # 896 lanes: 784 padded up to a vreg-aligned width
NCLS = 10                  # real number of classes
NOUT = 128                 # lane-padded FC output width


def _cdiv(a, b):
    return -(-a // b)


def _round_up(x, m):
    return _cdiv(x, m) * m


# ---------------------------------------------------------------------------
# Fused kernel: conv3x3(pad=1) + bias + ReLU + flatten + Linear per batch block
# ---------------------------------------------------------------------------
def fused_cnn_kernel(x_ref, wv_ref, cb_ref, fcw_ref, fcb_ref, out_ref):
    """Refs:
    x_ref   : (bB, 784)  src-dtype  flattened input images (lane-dense)
    wv_ref  : (9, 896)   f32  per-tap weight vectors (masks pre-folded),
                              row 3*di+dj = w[di,dj] * column-mask(dj)
    cb_ref  : (1,)       f32  conv bias (SMEM scalar)
    fcw_ref : (896, 128) f32  fc weight^T, zero rows >=784, zero cols >=10
    fcb_ref : (1, 128)   f32  fc bias, zero cols >=10
    out_ref : (bB, 128)  f32  lane-padded logits
    """
    xf = x_ref[...].astype(jnp.float32)                        # (bB, 784)
    bB = xf.shape[0]

    # Pad 784 -> 896 lanes once in VMEM; pad lanes are zero.
    xpad = jnp.concatenate(
        [xf, jnp.zeros((bB, NPAD - NPIX), jnp.float32)], axis=1)

    # Horizontal taps: lane rotation by +-1 (XLU).  Cross-row-boundary lanes
    # and the wrapped lane are zeroed by the pre-folded weight vectors.
    xl = pltpu.roll(xpad, shift=1, axis=1)          # xl[p] = xpad[p-1]: col j-1
    xr = pltpu.roll(xpad, shift=NPAD - 1, axis=1)   # xr[p] = xpad[p+1]: col j+1

    def row_sum(di):
        """Column-summed contribution of conv-weight row `di` at its source row."""
        base = 3 * di
        return (xl * wv_ref[base + 0:base + 1, :]
                + xpad * wv_ref[base + 1:base + 2, :]
                + xr * wv_ref[base + 2:base + 3, :])

    # Vertical taps: distribute the +-28 shift over the column sums (2 rolls
    # total).  The wrap lands in the 112 zero pad lanes of row_sum(.), which
    # therefore doubles as the top/bottom zero padding of the "same" conv.
    acc = (pltpu.roll(row_sum(0), shift=HW, axis=1)          # source row i-1
           + row_sum(1)                                      # source row i
           + pltpu.roll(row_sum(2), shift=NPAD - HW, axis=1))  # source row i+1

    act = jnp.maximum(acc + cb_ref[0], 0.0)         # conv bias + ReLU, (bB, 896)

    # Flatten is a no-op; FC weight has zero rows for the 112 pad lanes.
    out_ref[...] = (
        jnp.dot(act, fcw_ref[...], preferred_element_type=jnp.float32)
        + fcb_ref[...]
    )


# ---------------------------------------------------------------------------
# Wrapper
# ---------------------------------------------------------------------------
def single_layer_cnn_forward(x_nchw, conv_w, conv_b, fc_w, fc_b, *, block_b=1024):
    """Forward pass matching SingleLayerCNN.forward.

    x_nchw : (B, 1, 28, 28) any float/int dtype (cast to f32 inside the kernel)
    conv_w : (3, 3)    (conv1.weight squeezed)
    conv_b : (1,)      (conv1.bias)
    fc_w   : (10, 784) (fc1.weight)
    fc_b   : (10,)     (fc1.bias)
    returns: (B, 10) f32
    """
    B = x_nchw.shape[0]
    xf = x_nchw.reshape(B, NPIX)          # free reshape; keep source dtype (no upcast)

    # Batch block: multiple of 8 sublanes; force an even grid of >= 2 blocks so
    # both v7x TensorCores get work and the DMA pipeline always overlaps.
    bB = min(block_b, _round_up(_cdiv(B, 2), 8))
    nblk = _round_up(max(2, _cdiv(B, bB)), 2)
    Bp = nblk * bB
    if Bp != B:
        xf = jnp.pad(xf, ((0, Bp - B), (0, 0)))

    f32 = jnp.float32
    cw = conv_w.astype(f32)
    cb = conv_b.astype(f32).reshape(1)

    # Per-tap weight vectors with the column-boundary masks folded in
    # (tiny (9, 896) one-time computation, independent of batch size).
    j = jnp.arange(NPIX) % HW
    pad = jnp.zeros((NPAD - NPIX,), f32)
    mask_l = jnp.concatenate([(j > 0).astype(f32), pad])        # col j-1 valid
    mask_c = jnp.concatenate([jnp.ones((NPIX,), f32), pad])     # center
    mask_r = jnp.concatenate([(j < HW - 1).astype(f32), pad])   # col j+1 valid
    rows = []
    for di in range(K):
        rows += [cw[di, 0] * mask_l, cw[di, 1] * mask_c, cw[di, 2] * mask_r]
    wv = jnp.stack(rows, axis=0)                                # (9, 896)

    # FC weight^T / bias, zero-padded to lane-dense shapes.
    fcw = jnp.zeros((NPAD, NOUT), f32).at[:NPIX, :NCLS].set(fc_w.T.astype(f32))
    fcb = jnp.zeros((1, NOUT), f32).at[0, :NCLS].set(fc_b.astype(f32))

    out = pl.pallas_call(
        fused_cnn_kernel,
        out_shape=jax.ShapeDtypeStruct((Bp, NOUT), f32),
        grid=(nblk,),
        in_specs=[
            pl.BlockSpec((bB, NPIX), lambda i: (i, 0)),             # input batch block
            pl.BlockSpec((K * K, NPAD), lambda i: (0, 0)),          # tap weight vectors
            pl.BlockSpec(memory_space=pltpu.MemorySpace.SMEM),      # conv bias scalar
            pl.BlockSpec((NPAD, NOUT), lambda i: (0, 0)),           # fc weight^T
            pl.BlockSpec((1, NOUT), lambda i: (0, 0)),              # fc bias
        ],
        out_specs=pl.BlockSpec((bB, NOUT), lambda i: (i, 0)),
        compiler_params=pltpu.CompilerParams(
            dimension_semantics=("parallel",),
            # v7x-safe cap (64 MiB/TC physical); raise on v5e/v6e (128 MiB)
            # together with block_b if desired.
            vmem_limit_bytes=48 * 1024 * 1024,
        ),
    )(xf, wv, cb, fcw, fcb)

    return out[:B, :NCLS]


# ---------------------------------------------------------------------------
# Pure-JAX reference (mirrors the PyTorch module)
# ---------------------------------------------------------------------------
def reference_forward(x_nchw, conv_w, conv_b, fc_w, fc_b):
    conv = lax.conv_general_dilated(
        x_nchw.astype(jnp.float32),
        conv_w.reshape(1, 1, K, K).astype(jnp.float32),
        window_strides=(1, 1),
        padding="SAME",
        dimension_numbers=("NCHW", "OIHW", "NCHW"),
    ) + conv_b.reshape(1, 1, 1, 1)
    act = jnp.maximum(conv, 0.0)
    flat = act.reshape(act.shape[0], -1)
    return flat @ fc_w.T + fc_b


if __name__ == "__main__":
    key = jax.random.PRNGKey(0)
    k_x, k_cw, k_cb, k_fw, k_fb = jax.random.split(key, 5)

    B = 2
    x = jax.random.normal(k_x, (B, 1, HW, HW), dtype=jnp.float32)
    conv_w = jax.random.normal(k_cw, (K, K), dtype=jnp.float32) * 0.1
    conv_b = jax.random.normal(k_cb, (1,), dtype=jnp.float32) * 0.1
    fc_w = jax.random.normal(k_fw, (NCLS, NPIX), dtype=jnp.float32) * 0.01
    fc_b = jax.random.normal(k_fb, (NCLS,), dtype=jnp.float32) * 0.01

    out = single_layer_cnn_forward(x, conv_w, conv_b, fc_w, fc_b)
    out = jax.block_until_ready(out)

    ref = reference_forward(x, conv_w, conv_b, fc_w, fc_b)
    assert out.shape == (B, NCLS)
    assert jnp.allclose(out, ref, rtol=1e-4, atol=1e-4), "mismatch vs reference"

    print("KERNEL_OK")
</pallas_src>

<mosaic_0001>
module attributes {stable_mosaic.version = 11 : i64} {
  func.func @fused_cnn_kernel(%arg0: i32, %arg1: memref<8x784xf32, #tpu.memory_space<vmem>>, %arg2: memref<9x896xf32, #tpu.memory_space<vmem>>, %arg3: memref<1xf32, #tpu.memory_space<smem>>, %arg4: memref<896x128xf32, #tpu.memory_space<vmem>>, %arg5: memref<1x128xf32, #tpu.memory_space<vmem>>, %arg6: memref<8x128xf32, #tpu.memory_space<vmem>>) attributes {dimension_semantics = [#tpu.dimension_semantics<parallel>], iteration_bounds = array<i64: 2>, scalar_prefetch = 0 : i64, scratch_operands = 0 : i64, tpu.core_type = #tpu.core_type<tc>, window_params = [{transform_indices = @transform_0, window_bounds = array<i64: 8, 784>}, {pipeline_mode = #tpu.pipeline_mode<synchronous>, transform_indices = @transform_1, window_bounds = array<i64: 9, 896>}, {transform_indices = @transform_2, window_bounds = array<i64: 1>}, {pipeline_mode = #tpu.pipeline_mode<synchronous>, transform_indices = @transform_3, window_bounds = array<i64: 896, 128>}, {pipeline_mode = #tpu.pipeline_mode<synchronous>, transform_indices = @transform_4, window_bounds = array<i64: 1, 128>}, {transform_indices = @transform_5, window_bounds = array<i64: 8, 128>}]} {
    %c0 = arith.constant 0 : index
    %c0_0 = arith.constant 0 : index
    %0 = vector.load %arg1[%c0, %c0_0] : memref<8x784xf32, #tpu.memory_space<vmem>>, vector<8x784xf32>
    %cst = arith.constant 0.000000e+00 : f32
    %1 = vector.broadcast %cst : f32 to vector<8x112xf32>
    %2 = tpu.concatenate %0, %1 in 1 : vector<8x784xf32>, vector<8x112xf32> -> vector<8x896xf32>
    %c1_i32 = arith.constant 1 : i32
    %3 = tpu.dynamic_rotate %2 by %c1_i32 dim 1 : vector<8x896xf32>, i32 -> vector<8x896xf32>
    %c895_i32 = arith.constant 895 : i32
    %4 = tpu.dynamic_rotate %2 by %c895_i32 dim 1 : vector<8x896xf32>, i32 -> vector<8x896xf32>
    %c0_1 = arith.constant 0 : index
    %c0_2 = arith.constant 0 : index
    %5 = vector.load %arg2[%c0_1, %c0_2] : memref<9x896xf32, #tpu.memory_space<vmem>>, vector<1x896xf32>
    %6 = vector.broadcast %5 : vector<1x896xf32> to vector<8x896xf32>
    %7 = arith.mulf %3, %6 : vector<8x896xf32>
    %c1 = arith.constant 1 : index
    %c0_3 = arith.constant 0 : index
    %8 = vector.load %arg2[%c1, %c0_3] : memref<9x896xf32, #tpu.memory_space<vmem>>, vector<1x896xf32>
    %9 = vector.broadcast %8 : vector<1x896xf32> to vector<8x896xf32>
    %10 = arith.mulf %2, %9 : vector<8x896xf32>
    %11 = arith.addf %7, %10 : vector<8x896xf32>
    %c2 = arith.constant 2 : index
    %c0_4 = arith.constant 0 : index
    %12 = vector.load %arg2[%c2, %c0_4] : memref<9x896xf32, #tpu.memory_space<vmem>>, vector<1x896xf32>
    %13 = vector.broadcast %12 : vector<1x896xf32> to vector<8x896xf32>
    %14 = arith.mulf %4, %13 : vector<8x896xf32>
    %15 = arith.addf %11, %14 : vector<8x896xf32>
    %c28_i32 = arith.constant 28 : i32
    %16 = tpu.dynamic_rotate %15 by %c28_i32 dim 1 : vector<8x896xf32>, i32 -> vector<8x896xf32>
    %c3 = arith.constant 3 : index
    %c0_5 = arith.constant 0 : index
    %17 = vector.load %arg2[%c3, %c0_5] : memref<9x896xf32, #tpu.memory_space<vmem>>, vector<1x896xf32>
    %18 = vector.broadcast %17 : vector<1x896xf32> to vector<8x896xf32>
    %19 = arith.mulf %3, %18 : vector<8x896xf32>
    %c4 = arith.constant 4 : index
    %c0_6 = arith.constant 0 : index
    %20 = vector.load %arg2[%c4, %c0_6] : memref<9x896xf32, #tpu.memory_space<vmem>>, vector<1x896xf32>
    %21 = vector.broadcast %20 : vector<1x896xf32> to vector<8x896xf32>
    %22 = arith.mulf %2, %21 : vector<8x896xf32>
    %23 = arith.addf %19, %22 : vector<8x896xf32>
    %c5 = arith.constant 5 : index
    %c0_7 = arith.constant 0 : index
    %24 = vector.load %arg2[%c5, %c0_7] : memref<9x896xf32, #tpu.memory_space<vmem>>, vector<1x896xf32>
    %25 = vector.broadcast %24 : vector<1x896xf32> to vector<8x896xf32>
    %26 = arith.mulf %4, %25 : vector<8x896xf32>
    %27 = arith.addf %23, %26 : vector<8x896xf32>
    %28 = arith.addf %16, %27 : vector<8x896xf32>
    %c6 = arith.constant 6 : index
    %c0_8 = arith.constant 0 : index
    %29 = vector.load %arg2[%c6, %c0_8] : memref<9x896xf32, #tpu.memory_space<vmem>>, vector<1x896xf32>
    %30 = vector.broadcast %29 : vector<1x896xf32> to vector<8x896xf32>
    %31 = arith.mulf %3, %30 : vector<8x896xf32>
    %c7 = arith.constant 7 : index
    %c0_9 = arith.constant 0 : index
    %32 = vector.load %arg2[%c7, %c0_9] : memref<9x896xf32, #tpu.memory_space<vmem>>, vector<1x896xf32>
    %33 = vector.broadcast %32 : vector<1x896xf32> to vector<8x896xf32>
    %34 = arith.mulf %2, %33 : vector<8x896xf32>
    %35 = arith.addf %31, %34 : vector<8x896xf32>
    %c8 = arith.constant 8 : index
    %c0_10 = arith.constant 0 : index
    %36 = vector.load %arg2[%c8, %c0_10] : memref<9x896xf32, #tpu.memory_space<vmem>>, vector<1x896xf32>
    %37 = vector.broadcast %36 : vector<1x896xf32> to vector<8x896xf32>
    %38 = arith.mulf %4, %37 : vector<8x896xf32>
    %39 = arith.addf %35, %38 : vector<8x896xf32>
    %c868_i32 = arith.constant 868 : i32
    %40 = tpu.dynamic_rotate %39 by %c868_i32 dim 1 : vector<8x896xf32>, i32 -> vector<8x896xf32>
    %41 = arith.addf %28, %40 : vector<8x896xf32>
    %c0_11 = arith.constant 0 : index
    %42 = memref.load %arg3[%c0_11] : memref<1xf32, #tpu.memory_space<smem>>
    %43 = vector.broadcast %42 : f32 to vector<8x896xf32>
    %44 = arith.addf %41, %43 : vector<8x896xf32>
    %cst_12 = arith.constant 0.000000e+00 : f32
    %45 = vector.broadcast %cst_12 : f32 to vector<8x896xf32>
    %46 = arith.maximumf %44, %45 : vector<8x896xf32>
    %c0_13 = arith.constant 0 : index
    %c0_14 = arith.constant 0 : index
    %47 = vector.load %arg4[%c0_13, %c0_14] : memref<896x128xf32, #tpu.memory_space<vmem>>, vector<896x128xf32>
    %cst_15 = arith.constant dense<0.000000e+00> : vector<8x128xf32>
    %48 = tpu.matmul %46, %47, %cst_15 {dimension_numbers = #tpu.dot_dimension_numbers<[1], [0], [0], [1], [0, 0, 1, 1], [], []>} : vector<8x896xf32>, vector<896x128xf32>, vector<8x128xf32> -> vector<8x128xf32>
    %c0_16 = arith.constant 0 : index
    %c0_17 = arith.constant 0 : index
    %49 = vector.load %arg5[%c0_16, %c0_17] : memref<1x128xf32, #tpu.memory_space<vmem>>, vector<1x128xf32>
    %50 = vector.broadcast %49 : vector<1x128xf32> to vector<8x128xf32>
    %51 = arith.addf %48, %50 : vector<8x128xf32>
    %c0_18 = arith.constant 0 : index
    %c0_19 = arith.constant 0 : index
    %52 = vector.load %arg6[%c0_18, %c0_19] : memref<8x128xf32, #tpu.memory_space<vmem>>, vector<8x128xf32>
    tpu.vector_store %arg6[%c0_18, %c0_19], %51 {strides = array<i32>} : memref<8x128xf32, #tpu.memory_space<vmem>>, vector<8x128xf32>,
    return
  }
  func.func @transform_0(%arg0: i32) -> (i32, i32) {
    %c0_i32 = arith.constant 0 : i32
    %c0_i32_0 = arith.constant 0 : i32
    return %arg0, %c0_i32 : i32, i32
  }
  func.func @transform_1(%arg0: i32) -> (i32, i32) {
    %c0_i32 = arith.constant 0 : i32
    %c0_i32_0 = arith.constant 0 : i32
    %c0_i32_1 = arith.constant 0 : i32
    return %c0_i32, %c0_i32_0 : i32, i32
  }
  func.func @transform_2(%arg0: i32) -> i32 {
    %c0_i32 = arith.constant 0 : i32
    %c0_i32_0 = arith.constant 0 : i32
    return %c0_i32 : i32
  }
  func.func @transform_3(%arg0: i32) -> (i32, i32) {
    %c0_i32 = arith.constant 0 : i32
    %c0_i32_0 = arith.constant 0 : i32
    %c0_i32_1 = arith.constant 0 : i32
    return %c0_i32, %c0_i32_0 : i32, i32
  }
  func.func @transform_4(%arg0: i32) -> (i32, i32) {
    %c0_i32 = arith.constant 0 : i32
    %c0_i32_0 = arith.constant 0 : i32
    %c0_i32_1 = arith.constant 0 : i32
    return %c0_i32, %c0_i32_0 : i32, i32
  }
  func.func @transform_5(%arg0: i32) -> (i32, i32) {
    %c0_i32 = arith.constant 0 : i32
    %c0_i32_0 = arith.constant 0 : i32
    return %arg0, %c0_i32 : i32, i32
  }
}

</mosaic_0001>

<bundles_post_ra>
// kernel: tpu_custom_call.1
= control target key start
LH: loop header
LB: loop body
LE: loop exit
PB: predicated region body
PF: predicated region fallthrough
CT: control target
= control target key end

     0   :  { %s2610_s0 = inlined_call_operand.hbm [shape: f32[16,784], index: 0, kind: input, shape index: {}]   ;;  %s2611_s1 = inlined_call_operand.hbm [shape: f32[9,896], index: 1, kind: input, shape index: {}]   ;;  %s2612_s2 = inlined_call_operand.<no memory space> [shape: f32[1], index: 2, kind: input, shape index: {}]   ;;  %s2613_s3 = inlined_call_operand.hbm [shape: f32[896,128], index: 3, kind: input, shape index: {}]   ;;  %s2614_s4 = inlined_call_operand.vmem [shape: f32[1,128], index: 4, kind: input, shape index: {}]   ;;  %s2615_s5 = inlined_call_operand.hbm [shape: f32[16,128], index: 5, kind: output, shape index: {}]  }
   0x1   :  { %10 = sst [smem:[#allocation2]] %s2612_s2 }
   0x2   :  { %11 = vsyncpa [#allocation4], 0 }
   0x3   :  { %13 = vsyncpa [#allocation4 + $0x1], 0 }
   0x4   :  { %14 = vsyncpa [#allocation7], 0 }
   0x5   :  { %15 = vsyncpa [#allocation5], 0 }
   0x6   :  { %17 = vsyncpa [#allocation5 + $0x1], 0  ;;  %s1816_s20 = smov 0   ;;  %s1818_s21 = smov 0  }
   0x7   :  { %s1820_s22 = smov 0   ;;  %s1822_s23 = smov 0  }
   0x8 LB: > { %s1837_s2 = sadd.s32 4294967295, %s1767_s23   ;;  %s1367_s24 = sadd.s32 4294967294, %s1767_s23   ;;  %s1767_s23 = sphi %s1822_s23, %s2680_s23   ;;  %s1763_s22 = sphi %s1820_s22, %s2679_s22   ;;  %s1759_s21 = sphi %s1818_s21, %s2678_s21   ;;  %s1755_s20 = sphi %s1816_s20, %s2677_s20  }
   0x9   : > { %p43_p0 = scmp.ne.s32.totalorder %s1759_s21, %s1755_s20  ;;  %p2616_p1 = scmp.eq.s32.totalorder %s1837_s2, 0 }
   0xa   : > { %p157_p3 = scmp.eq.s32.totalorder %s1367_s24, 1  ;;  %p1368_p5 = scmp.ge.s32.totalorder %s1767_s23, 1 }
   0xb   : > { %p1846_p4 = por %p2616_p1, %p43_p0  ;;  %p164_p7 = scmp.lt.s32.totalorder %s1767_s23, 3 }
   0xc   : > { %p1851_p6 = por %p157_p3, %p43_p0  ;;  %s1769_s28 = smov [#allocation6]  }
   0xd   : > { %s2622_s25 = scalar_select %p1846_p4, 1, 0 }
   0xe   : > { %s2623_s26 = scalar_select %p1851_p6, 1, 0 }
   0xf   : > { %p1856_p8 = pnand %p1368_p5, %p164_p7  ;;  %s176_s29 = sshll.u32 %s1769_s28, 4  ;;  %s177_s29 = int_to_ptr.vmem [resolvable:$true] %s176_s29 }
  0x10   : > { %s1770_s6 = smov [#allocation8]   ;;  %s1630_s8 = scalar_lea.vmem %s177_s29, 1792 }
  0x11   : > { %s2624_s27 = scalar_select %p1856_p8, 1, 0 }
  0x12   : > { %p1554_p9 = pneg %p1856_p8  ;;  %s192_s7 = sshll.u32 %s1770_s6, 4  ;;  %s193_s7 = int_to_ptr.vmem [resolvable:$true] %s192_s7 }
  0x13   : > { %p1631_p13 = scmp.ne.s32.totalorder %s177_s29, %s1630_s8  ;;  %p1638_p5 = scmp.lt.s32.totalorder %s177_s29, %s177_s29 }
  0x14   : > { %p1865_p11 = pnand %p1554_p9, %p2616_p1  ;;  %p1639_p7 = scmp.lt.s32.totalorder %s1630_s8, %s1630_s8 }
  0x16   : > { %p1621_p12 = pneg %p1865_p11  ;;  %p1640_p10 = por %p1639_p7, %p1638_p5 }
  0x18   : > { %p1633_p0 = pnand %p1631_p13, %p1621_p12 }
  0x1a   : > { %p1634_p3 = pneg %p1633_p0 }
  0x1c   : > { %p1641_p9 = pnand %p1640_p10, %p1634_p3 }
  0x1e   : > { %1644 = shalt.err (!%p1641_p9)
}
  0x1f   : > { %s1771_s9 = smov 896   ;;  %s1772_s10 = smov 56  }
  0x20   : > { %1557 = dma.hbm_to_vmem [thread:$0]  (!%p1865_p11), %s2611_s1, 1792, %s177_s29, [#allocation7], %s1771_s9, %s1771_s9, %s1772_s10  }
  0x21   : > { %s1656_s13 = scalar_lea.vmem %s193_s7, 14336  ;;  %p1664_p2 = scmp.lt.s32.totalorder %s193_s7, %s193_s7 }
  0x22   : > { %p1657_p1 = scmp.ne.s32.totalorder %s193_s7, %s1656_s13  ;;  %p1665_p6 = scmp.lt.s32.totalorder %s1656_s13, %s1656_s13 }
  0x24   : > { %p1659_p13 = pnand %p1657_p1, %p1621_p12  ;;  %p1666_p5 = por %p1665_p6, %p1664_p2 }
  0x26   : > { %p1660_p0 = pneg %p1659_p13 }
  0x28   : > { %p1667_p10 = pnand %p1666_p5, %p1660_p0 }
  0x2a   : > { %1670 = shalt.err (!%p1667_p10)
}
  0x2b   : > { %s1773_s14 = smov 128   ;;  %s1774_s15 = smov 8  }
  0x2c   : > { %1560 = dma.hbm_to_vmem [thread:$0]  (!%p1865_p11), %s2613_s3, 14336, %s193_s7, [#allocation7], %s1773_s14, %s1773_s14, %s1774_s15  }
  0x2d   : > { %s1888_s18 = sadd.s32 1, %s1767_s23   ;;  %s30_s24 = sadd.s32 1, %s1763_s22 }
  0x2e   : > { %s27_s19 = ssub.s32 %s1767_s23, %s1888_s18  ;;  %p37_p2 = scmp.ne.s32.totalorder %s1763_s22, %s1759_s21 }
  0x2f   : > { %p28_p1 = scmp.eq.s32.totalorder %s27_s19, 0  ;;  %p38_p6 = scmp.eq.s32.totalorder %s1767_s23, 0 }
  0x30   : > { %p2626_p3 = scmp.eq.s32.totalorder %s1837_s2, 1  ;;  %p1571_p9 = scmp.lt.s32.totalorder %s1767_s23, 2 }
  0x31   : > { %s1897_s28 = scalar_select %p28_p1, %s1763_s22, %s30_s24  }
  0x32   : > { %p39_p12 = por %p38_p6, %p37_p2  ;;  %p1901_p7 = por %p2626_p3, %p37_p2 }
  0x33   : > { %s209_s30 = sand.u32 1, %s1763_s22   ;;  %s1540_s7 = smul.u32 896, %s1767_s23 }
  0x34   : > { %s2627_s29 = scalar_select %p1901_p7, 1, 0 }
  0x35   : > { %s1539_s6 = smul.u32 56, %s209_s30  ;;  %p1908_p11 = pnand %p1571_p9, %p39_p12 }
  0x36   : > { %s1915_s11 = scalar_lea.hbm %s2610_s0, %s1540_s7  ;;  %s210_s14 = scalar_lea.sflag [#allocation4], %s209_s30 }
  0x37   : > { %s213_s12 = scalar_lea.vmem [#allocation3], %s1539_s6  ;;  %s1671_s15 = scalar_lea.hbm %s1915_s11, 896 }
  0x38   : > { %s221_s13 = sshll.u32 %s213_s12, 4  ;;  %p1672_p13 = scmp.ne.s32.totalorder %s1915_s11, %s1671_s15  ;;  %s222_s13 = int_to_ptr.vmem [resolvable:$true] %s221_s13 }
  0x39   : > { %p1673_p0 = pneg %p1908_p11  ;;  %s1676_s19 = scalar_lea.hbm %s2610_s0, 1792 }
  0x3a   : > { %p1677_p1 = scmp.lt.s32.totalorder %s1915_s11, %s2610_s0  ;;  %p1678_p2 = scmp.lt.s32.totalorder %s1676_s19, %s1671_s15 }
  0x3b   : > { %p1674_p5 = pnand %p1673_p0, %p1672_p13 }
  0x3c   : > { %p1679_p6 = por %p1678_p2, %p1677_p1 }
  0x3d   : > { %p1675_p10 = pneg %p1674_p5 }
  0x3f   : > { %p1680_p12 = pnand %p1679_p6, %p1675_p10 }
  0x41   : > { %1683 = shalt.err (!%p1680_p12)
}
  0x42   : > { %s1684_s6 = scalar_lea.vmem %s222_s13, 896  ;;  %s1775_s30 = smov [#allocation3]  }
  0x43   : > { %p1685_p3 = scmp.ne.s32.totalorder %s222_s13, %s1684_s6  ;;  %s1689_s9 = sshll.u32 %s1775_s30, 4  ;;  %s1690_s9 = int_to_ptr.vmem [resolvable:$false] %s1689_s9 }
  0x44   : > { %s1691_s10 = scalar_lea.vmem %s1690_s9, 1792  ;;  %p1692_p13 = scmp.lt.s32.totalorder %s222_s13, %s1690_s9 }
  0x45   : > { %p1687_p9 = pnand %p1685_p3, %p1673_p0  ;;  %p1693_p5 = scmp.lt.s32.totalorder %s1691_s10, %s1684_s6 }
  0x47   : > { %p1688_p7 = pneg %p1687_p9  ;;  %p1694_p4 = por %p1693_p5, %p1692_p13 }
  0x49   : > { %p1695_p8 = pnand %p1694_p4, %p1688_p7 }
  0x4b   : > { %1698 = shalt.err (!%p1695_p8)
}
  0x4c   : > { %1564 = dma.hbm_to_vmem [thread:$0]  (!%p1908_p11), %s1915_s11, 896, %s222_s13, %s210_s14  }
  0x4d   : > { %p2629_p10 = scmp.ne.s32.totalorder %s2624_s27, 0 }
  0x4f   : > { %230 = sbr.rel (%p2629_p10) target bundleno = 613 (0x265), region = 40 }
  0x54   : > { %s1934_s12 = sand.u32 1, %s1759_s21   ;;  %p2630_p0 = scmp.ne.s32.totalorder %s2622_s25, 0 }
  0x55   : > { %s1541_s15 = smul.u32 56, %s1934_s12  ;;  %s233_s16 = scalar_lea.sflag [#allocation4], %s1934_s12 }
  0x57   : > { %s1938_s17 = scalar_lea.vmem [#allocation3], %s1541_s15 }
  0x58   : > { %1742 = dma.done.wait (%p2630_p0), %s233_s16, 896  }
  0x59   : > { %1744 = vsyncadd (%p2630_p0), %s233_s16, 4294966400  ;;  %p2631_p4 = scmp.eq.s32.totalorder %s1837_s2, 0 }
  0x5b   : > { %1746 = dma.done.wait (%p2631_p4), [#allocation7], 16128   ;;  %p2632_p8 = pmov %p2631_p4 }
  0x5c   : > { %v294_v0 = vlaneseq  ;;  %v1950_v2 = vld [vmem:[%s1938_s17 + $0x28] sm:$0xff]  ;;  %v1953_v3 = vld [vmem:[%s1938_s17] sm:$0xff]  ;;  %s1776_s27 = smov 1   ;;  %v277_v5 = vld [vmem:[%s1938_s17 + $0x30] sm:$0xff]  ;;  %vm278_vm0 = vcmask 130048   ;;  %s1777_s25 = smov 127  }
  0x5d   : > { %1748 = vsyncadd (%p2632_p8), [#allocation7], 4294951168  ;;  %2633 = vst [vmem:[#allocation13_spill] sm:$0xff] %v1950_v2  ;;  %290 = vrot.lane.b32.xlu1 %v1950_v2, %s1776_s27  ;;  %280 = vrot.lane.b32.xlu0 %v1953_v3, %s1776_s27  ;;  %v1960_v4 = vld [vmem:[%s1938_s17 + $0x8] sm:$0xff]  ;;  %v1973_v12 = vsel %vm278_vm0, %v277_v5, 0.0  ;;  %v1976_v13 = vld [vmem:[%s1938_s17 + $0x10] sm:$0xff] }
  0x5e   : > { %v331_v1 = vshrl.u32 %v294_v0, 7  ;;  %v550_v9 = vld [vmem:[#allocation6 + $0x4] ss:$8 sm:$0xf]  ;;  %2634 = vst [vmem:[#allocation14_spill] sm:$0xff] %v1973_v12  ;;  %v2041_v51 = vand.u32 127, %v294_v0 }
  0x5f   : > { %v551_v10 = vld [vmem:[#allocation6 + $0x4] ss:$8 sm:$0xf0]  ;;  %v326_v52 = vld [vmem:[#allocation6] ss:$8 sm:$0xf] }
  0x60   : > { %v1963_v6 = vsub.s32 1, %v331_v1  ;;  %v1965_v7 = vsub.s32 0, %v331_v1  ;;  %v1967_v8 = vsub.s32 6, %v331_v1  ;;  %v552_v11 = vor.u32 %v551_v10, %v550_v9  ;;  %v2009_v25 = vld [vmem:[%s1938_s17 + $0x18] sm:$0xff]  ;;  %v2020_v29 = vld [vmem:[%s1938_s17 + $0x20] sm:$0xff]  ;;  %v893_v38 = vld [vmem:[#allocation8 + $0xe8] sm:$0xff] }
  0x61   : > { %304 = vrot.lane.b32.xlu1 %v1953_v3, %s1777_s25  ;;  %282 = vrot.lane.b32.xlu0 %v1960_v4, %s1776_s27  ;;  %v1978_v14 = vsub.s32 2, %v331_v1  ;;  %v2000_v23 = vsub.s32 5, %v331_v1  ;;  %v2006_v24 = vsub.s32 3, %v331_v1  ;;  %v2016_v27 = vsub.s32 4, %v331_v1  ;;  %v895_v34 = vld [vmem:[#allocation8 + $0xf8] sm:$0xff]  ;;  %v894_v36 = vld [vmem:[#allocation8 + $0xf0] sm:$0xff] }
  0x62   : > { %v561_v15 = vrot.slane %v552_v11, %v1963_v6  ;;  %v557_v16 = vrot.slane %v552_v11, %v1965_v7  ;;  %v581_v17 = vrot.slane %v552_v11, %v1967_v8  ;;  %v879_v35 = vld [vmem:[#allocation8 + $0x78] sm:$0xff]  ;;  %1382 = vmatprep.subr.mxu0 %v895_v34  ;;  %v878_v37 = vld [vmem:[#allocation8 + $0x70] sm:$0xff]  ;;  %v877_v40 = vld [vmem:[#allocation8 + $0x68] sm:$0xff]  ;;  %vm296_vm1 = vcmp.lt.s32.totalorder %v2041_v51, 1  ;;  %s1778_s8 = smov 28   ;;  %s1779_s11 = smov 100  }
  0x63   : > { %v565_v21 = vrot.slane %v552_v11, %v1978_v14  ;;  %v577_v26 = vrot.slane %v552_v11, %v2000_v23  ;;  %v569_v28 = vrot.slane %v552_v11, %v2006_v24  ;;  %v573_v31 = vrot.slane %v552_v11, %v2016_v27  ;;  %1383 = vmatpush3.msra.mxu0 %v879_v35  ;;  %v927_v39 = vld [vmem:[#allocation8 + $0x1f8] sm:$0xff]  ;;  %v892_v42 = vld [vmem:[#allocation8 + $0xe0] sm:$0xff]  ;;  %v926_v43 = vld [vmem:[#allocation8 + $0x1f0] sm:$0xff]  ;;  %s848_s13 = sld [smem:[#allocation2]]  ;;  %s1376_s24 = sshll.u32 %s1934_s12, 3 }
  0x64   : > { %v1988_v18 = vmul.f32 %v561_v15, %v1960_v4  ;;  %v1991_v19 = vmul.f32 %v581_v17, %v1973_v12  ;;  %v1994_v20 = vmul.f32 %v557_v16, %v1953_v3  ;;  %1384 = vmatprep.subr.mxu0 %v894_v36  ;;  %1417 = vmatprep.subr.mxu1 %v927_v39  ;;  %v911_v41 = vld [vmem:[#allocation8 + $0x178] sm:$0xff]  ;;  %v910_v44 = vld [vmem:[#allocation8 + $0x170] sm:$0xff]  ;;  %v876_v45 = vld [vmem:[#allocation8 + $0x60] sm:$0xff]  ;;  %vm318_vm2 = vcmp.lt.s32.totalorder %v2041_v51, 127  ;;  %s1379_s7 = sshll.u32 %s1837_s2, 7  ;;  %s270_s6 = scalar_lea.vmem [#allocation9], %s1376_s24 }
  0x65   : > { %292 = vrot.lane.b32.xlu1 %v1973_v12, %s1776_s27  ;;  %284 = vrot.lane.b32.xlu0 %v1976_v13, %s1776_s27  ;;  %v1998_v22 = vmul.f32 %v565_v21, %v1976_v13  ;;  %v2023_v30 = vmul.f32 %v577_v26, %v1950_v2  ;;  %v2027_v32 = vmul.f32 %v569_v28, %v2009_v25  ;;  %v925_v46 = vld [vmem:[#allocation8 + $0x1e8] sm:$0xff]  ;;  %v891_v47 = vld [vmem:[#allocation8 + $0xd8] sm:$0xff]  ;;  %v890_v49 = vld [vmem:[#allocation8 + $0xd0] sm:$0xff]  ;;  %vm494_vm3 = vcmp.lt.s32.totalorder %v2041_v51, 28  ;;  %s1278_s30 = sshll.u32 %s270_s6, 4  ;;  %s2573_s15 = scalar_lea.hbm %s2615_s5, %s1379_s7  ;;  %s1279_s30 = int_to_ptr.vmem [resolvable:$true] %s1278_s30 }
  0x66   : > { %v2034_v33 = vmul.f32 %v573_v31, %v2020_v29  ;;  %1385 = vmatpush3.msra.mxu0 %v878_v37  ;;  %1418 = vmatpush3.msra.mxu1 %v911_v41  ;;  %v875_v48 = vld [vmem:[#allocation8 + $0x58] sm:$0xff]  ;;  %v874_v50 = vld [vmem:[#allocation8 + $0x50] sm:$0xff]  ;;  %v873_v41 = vld [vmem:[#allocation8 + $0x48] sm:$0xff]  ;;  %vm833_vm4 = vcmp.lt.s32.totalorder %v2041_v51, 100  ;;  %vm1781_vm5 = vmmov 0   ;;  %s1265_s16 = scalar_lea.sflag [#allocation5], %s1934_s12 }
  0x67   : > { %1386 = vmatprep.subr.mxu0 %v893_v38  ;;  %1419 = vmatprep.subr.mxu1 %v926_v43  ;;  %v327_v53 = vld [vmem:[#allocation6] ss:$8 sm:$0xf0]  ;;  %v503_v54 = vld [vmem:[#allocation6 + $0x3] ss:$8 sm:$0xf] }
  0x68   : > { %1387 = vmatpush3.msra.mxu0 %v877_v40  ;;  %1420 = vmatpush3.msra.mxu1 %v910_v44  ;;  %v504_v55 = vld [vmem:[#allocation6 + $0x3] ss:$8 sm:$0xf0]  ;;  %v665_v56 = vld [vmem:[#allocation6 + $0x6] ss:$8 sm:$0xf]  ;;  %v2043_v60 = vor.u32 %v327_v53, %v326_v52 }
  0x69   : > { %308 = vrot.lane.b32.xlu1 %v1976_v13, %s1777_s25  ;;  %306 = vrot.lane.b32.xlu0 %v1960_v4, %s1777_s25  ;;  %v666_v57 = vld [vmem:[#allocation6 + $0x6] ss:$8 sm:$0xf0]  ;;  %v427_v58 = vld [vmem:[#allocation6 + $0x2] ss:$8 sm:$0xf]  ;;  %v2045_v61 = vor.u32 %v504_v55, %v503_v54 }
  0x6a   : > { %1388 = vmatprep.subr.mxu0 %v892_v42  ;;  %1421 = vmatprep.subr.mxu1 %v925_v46  ;;  %v428_v59 = vld [vmem:[#allocation6 + $0x2] ss:$8 sm:$0xf0]  ;;  %v604_v62 = vld [vmem:[#allocation6 + $0x5] ss:$8 sm:$0xf]  ;;  %v2047_v9 = vor.u32 %v666_v57, %v665_v56  ;;  %v337_v11 = vrot.slane %v2043_v60, %v1963_v6 }
  0x6b   : > { %1389 = vmatpush3.msra.mxu0 %v876_v45  ;;  %v605_v63 = vld [vmem:[#allocation6 + $0x5] ss:$8 sm:$0xf0]  ;;  %v766_v1 = vld [vmem:[#allocation6 + $0x38] ss:$8 sm:$0xf]  ;;  %v514_v15 = vrot.slane %v2045_v61, %v1963_v6  ;;  %v2055_v17 = vor.u32 %v428_v59, %v427_v58  ;;  %v510_v37 = vrot.slane %v2045_v61, %v1965_v7  ;;  %v534_v38 = vrot.slane %v2045_v61, %v1967_v8 }
  0x6c   : > { %1390 = vmatprep.subr.mxu0 %v891_v47  ;;  %v767_v5 = vld [vmem:[#allocation6 + $0x38] ss:$8 sm:$0xf0]  ;;  %v373_v0 = vld [vmem:[#allocation6 + $0x1] ss:$8 sm:$0xf]  ;;  %v2060_v31 = vor.u32 %v605_v63, %v604_v62  ;;  %v676_v36 = vrot.slane %v2047_v9, %v1963_v6  ;;  %v518_v42 = vrot.slane %v2045_v61, %v1978_v14  ;;  %v680_v44 = vrot.slane %v2047_v9, %v1978_v14 }
  0x6d   : > { %310 = vrot.lane.b32.xlu1 %v2009_v25, %s1777_s25  ;;  %316 = vrot.lane.b32.xlu0 %v1973_v12, %s1777_s25  ;;  %v374_v10 = vld [vmem:[#allocation6 + $0x1] ss:$8 sm:$0xf0]  ;;  %v712_v21 = vld [vmem:[#allocation6 + $0x7] ss:$8 sm:$0xf]  ;;  %v2062_v34 = vor.u32 %v767_v5, %v766_v1  ;;  %v438_v46 = vrot.slane %v2055_v17, %v1963_v6 }
  0x6e   : > { %1391 = vmatpush3.msra.mxu0 %v875_v48  ;;  %v713_v26 = vld [vmem:[#allocation6 + $0x7] ss:$8 sm:$0xf0]  ;;  %v2064_v35 = vor.u32 %v374_v10, %v373_v0  ;;  %s1699_s17 = scalar_lea.vmem %s1279_s30, 128  ;;  %p2674_p11 = scmp.ne.s32.totalorder %s2627_s29, 0 }
  0x6f   : > { %1392 = vmatprep.subr.mxu0 %v890_v49  ;;  %v2080_v43 = vor.u32 %v713_v26, %v712_v21  ;;  %v889_v0 = vld [vmem:[#allocation8 + $0xc8] sm:$0xff]  ;;  %v908_v56 = vld [vmem:[#allocation8 + $0x160] sm:$0xff]  ;;  %v923_v55 = vld [vmem:[#allocation8 + $0x1d8] sm:$0xff]  ;;  %p1700_p7 = scmp.ne.s32.totalorder %s1279_s30, %s1699_s17 }
  0x70   : > { %1393 = vmatpush3.msra.mxu0 %v874_v50  ;;  %v384_v52 = vrot.slane %v2064_v35, %v1963_v6  ;;  %v909_v47 = vld [vmem:[#allocation8 + $0x168] sm:$0xff]  ;;  %v872_v28 = vld [vmem:[#allocation8 + $0x40] sm:$0xff]  ;;  %v871_v45 = vld [vmem:[#allocation8 + $0x38] sm:$0xff] }
  0x71   : > { %288 = vrot.lane.b32.xlu1 %v2020_v29, %s1776_s27  ;;  %286 = vrot.lane.b32.xlu0 %v2009_v25, %s1776_s27  ;;  %v727_v63 = vrot.slane %v2080_v43, %v1978_v14  ;;  %v723_v1 = vrot.slane %v2080_v43, %v1963_v6  ;;  %v719_v50 = vrot.slane %v2080_v43, %v1965_v7  ;;  %v962_v51 = vld [vmem:[#allocation8 + $0x310] sm:$0xff]  ;;  %p1701_p1 = pnand %p1700_p7, %p2674_p11  ;;  %s1782_s27 = smov [#allocation9]  }
  0x72   : > { %v2125_v26 = vmul.f32 %v384_v52, %v1960_v4  ;;  %1394 = vmatprep.subr.mxu0 %v889_v0  ;;  %1422 = vmatpush3.msra.mxu1 %v909_v47  ;;  %v380_v0 = vrot.slane %v2064_v35, %v1965_v7  ;;  %v907_v47 = vld [vmem:[#allocation8 + $0x158] sm:$0xff]  ;;  %s1703_s2 = sshll.u32 %s1782_s27, 4  ;;  %s1704_s2 = int_to_ptr.vmem [resolvable:$false] %s1703_s2 }
  0x73   : > { %v2144_v40 = vmul.f32 %v727_v63, %v1976_v13  ;;  %v2147_v5 = vmul.f32 %v723_v1, %v1960_v4  ;;  %v924_v4 = vld [vmem:[#allocation8 + $0x1e0] sm:$0xff]  ;;  %1395 = vmatpush3.msra.mxu0 %v873_v41  ;;  %v392_v63 = vrot.slane %v2064_v35, %v2006_v24  ;;  %v404_v41 = vrot.slane %v2064_v35, %v1967_v8  ;;  %p1702_p2 = pneg %p1701_p1  ;;  %p1706_p6 = scmp.lt.s32.totalorder %s1279_s30, %s1704_s2 }
  0x74   : > { %v888_v1 = vld [vmem:[#allocation8 + $0xc0] sm:$0xff]  ;;  %1423 = vmatprep.subr.mxu1 %v924_v4  ;;  %v735_v4 = vrot.slane %v2080_v43, %v2016_v27 }
  0x75   : > { %314 = vrot.lane.b32.xlu1 %v1950_v2, %s1777_s25  ;;  %312 = vrot.lane.b32.xlu0 %v2020_v29, %s1777_s25  ;;  %v2215_v53 = vmul.f32 %v392_v63, %v2009_v25  ;;  %v2229_v63 = vmul.f32 %v404_v41, %v1973_v12  ;;  %s1705_s25 = scalar_lea.vmem %s1704_s2, 256 }
  0x76   : > { %1396 = vmatprep.subr.mxu0 %v888_v1  ;;  %1424 = vmatpush3.msra.mxu1 %v908_v56  ;;  %p1707_p12 = scmp.lt.s32.totalorder %s1705_s25, %s1699_s17 }
  0x77   : > { %1397 = vmatpush3.msra.mxu0 %v872_v28  ;;  %1425 = vmatprep.subr.mxu1 %v923_v55  ;;  %v2205_v55 = vmul.f32 %v719_v50, %v1953_v3  ;;  %v922_v50 = vld [vmem:[#allocation8 + $0x1d0] sm:$0xff] }
  0x78   : > { %1426 = vmatpush3.msra.mxu1 %v907_v47  ;;  %v2635_v47 = vrot.slane %v2060_v31, %v1965_v7  ;;  %p1708_p3 = por %p1707_p12, %p1706_p6 }
  0x79   : > { %1427 = vmatprep.subr.mxu1 %v922_v50  ;;  %v2639_v50 = vrot.slane %v2047_v9, %v1965_v7 }
  0x7a   : > { %p1709_p9 = pnand %p1708_p3, %p1702_p2 }
  0xcf   : > { %v2106_v57 = vpop.permute.xlu1 %290  ;;  %v281_v58 = vpop.permute.xlu0 %280 }
  0xd3   : > { %v2141_v21 = vpop.permute.xlu1 %304  ;;  %v283_v62 = vpop.permute.xlu0 %282 }
  0xd4   : > { %v302_v52 = vsel %vm296_vm1, %v281_v58, %v283_v62 }
  0xd5   : > { %v543_v10 = vmul.f32 %v514_v15, %v302_v52  ;;  %v366_v56 = vmul.f32 %v337_v11, %v302_v52  ;;  %v705_v39 = vmul.f32 %v676_v36, %v302_v52  ;;  %v906_v36 = vld [vmem:[#allocation8 + $0x150] sm:$0xff] }
  0xd6   : > { %1428 = vmatpush3.msra.mxu1 %v906_v36  ;;  %v869_v36 = vld [vmem:[#allocation8 + $0x28] sm:$0xff] }
  0xd7   : > { %v2173_v15 = vadd.f32 %v1988_v18, %v543_v10  ;;  %v293_v59 = vpop.permute.xlu1 %292  ;;  %v2175_v54 = vpop.permute.xlu0 %284 }
  0xd8   : > { %v2188_v18 = vsel %vm296_vm1, %v2106_v57, %v293_v59  ;;  %v303_v10 = vsel %vm296_vm1, %v293_v59, %v281_v58  ;;  %v2195_v1 = vsel %vm296_vm1, %v283_v62, %v2175_v54  ;;  %v388_v58 = vrot.slane %v2064_v35, %v1978_v14  ;;  %v887_v59 = vld [vmem:[#allocation8 + $0xb8] sm:$0xff] }
  0xd9   : > { %v542_v28 = vmul.f32 %v510_v37, %v303_v10  ;;  %v548_v11 = vmul.f32 %v534_v38, %v2188_v18  ;;  %v544_v62 = vmul.f32 %v518_v42, %v2195_v1  ;;  %v412_v37 = vmul.f32 %v380_v0, %v1953_v3  ;;  %1398 = vmatprep.subr.mxu0 %v887_v59  ;;  %v886_v0 = vld [vmem:[#allocation8 + $0xb0] sm:$0xff] }
  0xda   : > { %v400_v38 = vrot.slane %v2064_v35, %v2000_v23  ;;  %1399 = vmatpush3.msra.mxu0 %v871_v45  ;;  %v706_v52 = vmul.f32 %v680_v44, %v2195_v1  ;;  %v870_v45 = vld [vmem:[#allocation8 + $0x30] sm:$0xff]  ;;  %v2259_v44 = vmul.f32 %v388_v58, %v1976_v13 }
  0xdb   : > { %v2223_v16 = vadd.f32 %v1994_v20, %v542_v28  ;;  %v2226_v49 = vadd.f32 %v1991_v19, %v548_v11  ;;  %v309_v42 = vpop.permute.xlu1 %308  ;;  %v307_v3 = vpop.permute.xlu0 %306  ;;  %v2232_v59 = vadd.f32 %v1998_v22, %v544_v62  ;;  %v420_v19 = vadd.f32 %v2125_v26, %v366_v56  ;;  %1400 = vmatprep.subr.mxu0 %v886_v0 }
  0xdc   : > { %v323_v48 = vsel %vm318_vm2, %v307_v3, %v309_v42  ;;  %v324_v20 = vsel %vm318_vm2, %v2141_v21, %v307_v3  ;;  %v2636_v28 = vrot.slane %v2060_v31, %v1963_v6  ;;  %v2256_v56 = vmul.f32 %v735_v4, %v2020_v29  ;;  %1401 = vmatpush3.msra.mxu0 %v870_v45 }
  0xdd   : > { %v467_v22 = vmul.f32 %v438_v46, %v323_v48  ;;  %v2250_v41 = vmul.f32 %v2635_v47, %v324_v20  ;;  %v2262_v11 = vmul.f32 %v400_v38, %v1950_v2  ;;  %v2638_v62 = vrot.slane %v2043_v60, %v1965_v7  ;;  %v921_v38 = vld [vmem:[#allocation8 + $0x1c8] sm:$0xff] }
  0xde   : > { %v644_v26 = vmul.f32 %v2636_v28, %v323_v48  ;;  %v704_v47 = vmul.f32 %v2639_v50, %v303_v10  ;;  %v885_v2 = vld [vmem:[#allocation8 + $0xa8] sm:$0xff]  ;;  %v2640_v0 = vrot.slane %v2062_v34, %v1963_v6  ;;  %v2641_v50 = vrot.slane %v2055_v17, %v1965_v7  ;;  %1429 = vmatprep.subr.mxu1 %v921_v38 }
  0xdf   : > { %2637 = vst [vmem:[#allocation15_spill] sm:$0xff] %v2262_v11  ;;  %v365_v3 = vmul.f32 %v2638_v62, %v303_v10  ;;  %v2272_v4 = vpop.permute.xlu1 %310  ;;  %v317_v28 = vpop.permute.xlu0 %316  ;;  %v474_v13 = vadd.f32 %v467_v22, %v420_v19  ;;  %v759_v19 = vadd.f32 %v2147_v5, %v705_v39  ;;  %v905_v22 = vld [vmem:[#allocation8 + $0x148] sm:$0xff]  ;;  %v2642_v6 = vrot.slane %v2060_v31, %v1978_v14  ;;  %v920_v5 = vld [vmem:[#allocation8 + $0x1c0] sm:$0xff] }
  0xe0   : > { %v806_v46 = vmul.f32 %v2640_v0, %v323_v48  ;;  %v322_v62 = vsel %vm318_vm2, %v309_v42, %v2272_v4  ;;  %v2285_v10 = vsel %vm318_vm2, %v317_v28, %v2141_v21  ;;  %v466_v58 = vmul.f32 %v2641_v50, %v324_v20  ;;  %1402 = vmatprep.subr.mxu0 %v885_v2 }
  0xe1   : > { %v2294_v48 = vmul.f32 %v2642_v6, %v322_v62  ;;  %v2643_v42 = vrot.slane %v2062_v34, %v1978_v14  ;;  %482 = vrot.lane.b32.xlu1 %v474_v13, %s1778_s8  ;;  %v760_v39 = vadd.f32 %v2144_v40, %v706_v52  ;;  %v2644_v21 = vrot.slane %v2062_v34, %v1965_v7 }
  0xe2   : > { %v2645_v50 = vrot.slane %v2060_v31, %v1967_v8  ;;  %v2311_v12 = vadd.f32 %v644_v26, %v2173_v15  ;;  %v758_v40 = vadd.f32 %v2205_v55, %v704_v47  ;;  %v419_v52 = vadd.f32 %v412_v37, %v365_v3  ;;  %1430 = vmatpush3.msra.mxu1 %v905_v22  ;;  %v884_v26 = vld [vmem:[#allocation8 + $0xa0] sm:$0xff] }
  0xe3   : > { %v807_v0 = vmul.f32 %v2643_v42, %v322_v62  ;;  %v805_v45 = vmul.f32 %v2644_v21, %v324_v20  ;;  %v289_v42 = vpop.permute.xlu1 %288  ;;  %v287_v13 = vpop.permute.xlu0 %286  ;;  %1403 = vmatpush3.msra.mxu0 %v869_v36  ;;  %v813_v15 = vadd.f32 %v806_v46, %v759_v19  ;;  %1431 = vmatprep.subr.mxu1 %v920_v5  ;;  %v904_v46 = vld [vmem:[#allocation8 + $0x140] sm:$0xff] }
  0xe4   : > { %v2308_v6 = vmul.f32 %v2645_v50, %v2285_v10  ;;  %v2317_v7 = vsel %vm296_vm1, %v289_v42, %v2106_v57  ;;  %v2321_v20 = vsel %vm296_vm1, %v287_v13, %v289_v42  ;;  %v300_v2 = vsel %vm296_vm1, %v2175_v54, %v287_v13  ;;  %1404 = vmatprep.subr.mxu0 %v884_v26  ;;  %v919_v26 = vld [vmem:[#allocation8 + $0x1b8] sm:$0xff] }
  0xe5   : > { %v814_v11 = vadd.f32 %v807_v0, %v760_v39  ;;  %v2646_v55 = vrot.slane %v2043_v60, %v1967_v8  ;;  %v2647_v57 = vrot.slane %v2043_v60, %v1978_v14  ;;  %v2648_v47 = vrot.slane %v2045_v61, %v2000_v23  ;;  %821 = vrot.lane.b32.xlu1 %v813_v15, %s1779_s11 }
  0xe6   : > { %v473_v54 = vadd.f32 %v466_v58, %v419_v52  ;;  %v2649_v19 = vrot.slane %v2043_v60, %v2006_v24  ;;  %v2650_v36 = vrot.slane %v2045_v61, %v2006_v24  ;;  %v812_v5 = vadd.f32 %v805_v45, %v758_v40  ;;  %1432 = vmatpush3.msra.mxu1 %v904_v46 }
  0xe7   : > { %v371_v37 = vmul.f32 %v2646_v55, %v2188_v18  ;;  %v367_v3 = vmul.f32 %v2647_v57, %v2195_v1  ;;  %v547_v38 = vmul.f32 %v2648_v47, %v2317_v7  ;;  %823 = vrot.lane.b32.xlu0 %v814_v11, %s1779_s11  ;;  %v2651_v1 = vrot.slane %v2045_v61, %v2016_v27  ;;  %v315_v52 = vpop.permute.xlu1 %314  ;;  %v313_v55 = vpop.permute.xlu0 %312 }
  0xe8   : > { %v368_v22 = vmul.f32 %v2649_v19, %v300_v2  ;;  %v545_v0 = vmul.f32 %v2650_v36, %v300_v2  ;;  %v2652_v11 = vrot.slane %v2055_v17, %v1978_v14  ;;  %v2653_v21 = vrot.slane %v2055_v17, %v1967_v8  ;;  %1433 = vmatprep.subr.mxu1 %v919_v26  ;;  %v901_v26 = vld [vmem:[#allocation8 + $0x128] sm:$0xff] }
  0xe9   : > { %v546_v39 = vmul.f32 %v2651_v1, %v2321_v20  ;;  %v601_v42 = vadd.f32 %v2023_v30, %v547_v38  ;;  %v2654_v13 = vrot.slane %v2047_v9, %v2016_v27  ;;  %v2370_v40 = vsel %vm318_vm2, %v313_v55, %v315_v52  ;;  %v868_v30 = vld [vmem:[#allocation8 + $0x20] sm:$0xff]  ;;  %819 = vrot.lane.b32.xlu1 %v812_v5, %s1779_s11 }
  0xea   : > { %v468_v58 = vmul.f32 %v2652_v11, %v322_v62  ;;  %v472_v50 = vmul.f32 %v2653_v21, %v2285_v10  ;;  %v599_v45 = vadd.f32 %v2027_v32, %v545_v0  ;;  %v2366_v62 = vsel %vm318_vm2, %v315_v52, %v317_v28  ;;  %1405 = vmatpush3.msra.mxu0 %v868_v30 }
  0xeb   : > { %v708_v61 = vmul.f32 %v2654_v13, %v2321_v20  ;;  %v600_v14 = vadd.f32 %v2034_v33, %v546_v39  ;;  %v2655_v15 = vrot.slane %v2060_v31, %v2000_v23  ;;  %v321_v32 = vsel %vm318_vm2, %v2272_v4, %v313_v55  ;;  %480 = vrot.lane.b32.xlu0 %v473_v54, %s1778_s8  ;;  %v903_v39 = vld [vmem:[#allocation8 + $0x138] sm:$0xff]  ;;  %v902_v55 = vld [vmem:[#allocation8 + $0x130] sm:$0xff] }
  0xec   : > { %v425_v33 = vadd.f32 %v2229_v63, %v371_v37  ;;  %v421_v28 = vadd.f32 %v2259_v44, %v367_v3  ;;  %v2656_v47 = vrot.slane %v2055_v17, %v2006_v24  ;;  %v2657_v46 = vrot.slane %v2060_v31, %v2006_v24  ;;  %v883_v37 = vld [vmem:[#allocation8 + $0x98] sm:$0xff]  ;;  %1434 = vmatpush3.msra.mxu1 %v903_v39 }
  0xed   : > { %v648_v57 = vmul.f32 %v2655_v15, %v2366_v62  ;;  %v2658_v36 = vrot.slane %v2060_v31, %v2016_v27  ;;  %v422_v63 = vadd.f32 %v2215_v53, %v368_v22  ;;  %v2659_v3 = vrot.slane %v2080_v43, %v2006_v24  ;;  %1406 = vmatprep.subr.mxu0 %v883_v37  ;;  %v866_v15 = vld [vmem:[#allocation8 + $0x10] sm:$0xff] }
  0xee   : > { %v469_v38 = vmul.f32 %v2656_v47, %v321_v32  ;;  %v646_v19 = vmul.f32 %v2657_v46, %v321_v32  ;;  %v479_v44 = vadd.f32 %v472_v50, %v425_v33  ;;  %v743_v0 = vrot.slane %v2080_v43, %v1967_v8  ;;  %v918_v50 = vld [vmem:[#allocation8 + $0x1b0] sm:$0xff] }
  0xef   : > { %v647_v4 = vmul.f32 %v2658_v36, %v2370_v40  ;;  %v754_v54 = vmul.f32 %v2659_v3, %v2009_v25  ;;  %v2660_v1 = vrot.slane %v2064_v35, %v2016_v27  ;;  %v2661_v53 = vrot.slane %v2062_v34, %v2016_v27  ;;  %v867_v25 = vld [vmem:[#allocation8 + $0x18] sm:$0xff]  ;;  %v882_v35 = vld [vmem:[#allocation8 + $0x90] sm:$0xff]  ;;  %1435 = vmatprep.subr.mxu1 %v918_v50  ;;  %v912_v50 = vld [vmem:[#allocation8 + $0x180] sm:$0xff] }
  0xf0   : > { %v476_v5 = vadd.f32 %v469_v38, %v422_v63  ;;  %v762_v11 = vadd.f32 %v2256_v56, %v708_v61  ;;  %v475_v21 = vadd.f32 %v468_v58, %v421_v28  ;;  %v2662_v13 = vrot.slane %v2047_v9, %v2006_v24  ;;  %492 = vrot.lane.b32.xlu0 %v479_v44, %s1778_s8  ;;  %v916_v38 = vld [vmem:[#allocation8 + $0x1a0] sm:$0xff]  ;;  %v2669_v36 = vld [vmem:[#allocation14_spill] sm:$0xff] }
  0xf1   : > { %v416_v31 = vmul.f32 %v2660_v1, %v2020_v29  ;;  %v809_v22 = vmul.f32 %v2661_v53, %v2370_v40  ;;  %v2415_v29 = vadd.f32 %v2250_v41, %v2223_v16  ;;  %v2419_v56 = vadd.f32 %v2294_v48, %v2232_v59  ;;  %1407 = vmatpush3.msra.mxu0 %v867_v25  ;;  %v917_v59 = vld [vmem:[#allocation8 + $0x1a8] sm:$0xff]  ;;  %v880_v63 = vld [vmem:[#allocation8 + $0x80] sm:$0xff]  ;;  %v915_v53 = vld [vmem:[#allocation8 + $0x198] sm:$0xff] }
  0xf2   : > { %v707_v52 = vmul.f32 %v2662_v13, %v300_v2  ;;  %v2663_v58 = vrot.slane %v2043_v60, %v2000_v23  ;;  %v2664_v2 = vrot.slane %v2043_v60, %v2016_v27  ;;  %v2665_v16 = vrot.slane %v2062_v34, %v2006_v24  ;;  %486 = vrot.lane.b32.xlu1 %v476_v5, %s1778_s8  ;;  %v959_v5 = vld [vmem:[#allocation8 + $0x2f8] sm:$0xff]  ;;  %v897_v25 = vld [vmem:[#allocation8 + $0x108] sm:$0xff] }
  0xf3   : > { %v2433_v48 = vadd.f32 %v646_v19, %v599_v45  ;;  %v2437_v33 = vadd.f32 %v2308_v6, %v2226_v49  ;;  %v2439_v28 = vadd.f32 %v647_v4, %v600_v14  ;;  %v2666_v24 = vrot.slane %v2055_v17, %v2000_v23  ;;  %1408 = vmatprep.subr.mxu0 %v882_v35  ;;  %v865_v14 = vld [vmem:[#allocation8 + $0x8] sm:$0xff] }
  0xf4   : > { %v370_v61 = vmul.f32 %v2663_v58, %v2317_v7  ;;  %v369_v30 = vmul.f32 %v2664_v2, %v2321_v20  ;;  %v808_v41 = vmul.f32 %v2665_v16, %v321_v32  ;;  %v816_v20 = vadd.f32 %v809_v22, %v762_v11  ;;  %1436 = vmatpush3.msra.mxu1 %v902_v55  ;;  %v881_v32 = vld [vmem:[#allocation8 + $0x88] sm:$0xff]  ;;  %v899_v22 = vld [vmem:[#allocation8 + $0x118] sm:$0xff] }
  0xf5   : > { %v471_v60 = vmul.f32 %v2666_v24, %v2366_v62  ;;  %v2445_v47 = vadd.f32 %v648_v57, %v601_v42  ;;  %v793_v45 = vrot.slane %v2062_v34, %v2000_v23  ;;  %484 = vrot.lane.b32.xlu0 %v475_v21, %s1778_s8  ;;  %v761_v49 = vadd.f32 %v754_v54, %v707_v52  ;;  %v2668_v42 = vld [vmem:[#allocation15_spill] sm:$0xff]  ;;  %v898_v21 = vld [vmem:[#allocation8 + $0x110] sm:$0xff] }
  0xf6   : > { %v739_v6 = vrot.slane %v2080_v43, %v2000_v23  ;;  %1409 = vmatpush3.msra.mxu0 %v866_v15  ;;  %v2667_v46 = vrot.slane %v2047_v9, %v1967_v8  ;;  %827 = vrot.lane.b32.xlu1 %v816_v20, %s1779_s11  ;;  %v424_v57 = vadd.f32 %v2668_v42, %v370_v61  ;;  %v900_v54 = vld [vmem:[#allocation8 + $0x120] sm:$0xff]  ;;  %v1780_v52 = vmov 0.0  }
  0xf7   : > { %v757_v4 = vmul.f32 %v743_v0, %v2669_v36  ;;  %1437 = vmatprep.subr.mxu1 %v917_v59  ;;  %v2670_v43 = vrot.slane %v2055_v17, %v2016_v27  ;;  %v815_v44 = vadd.f32 %v808_v41, %v761_v49  ;;  %v423_v3 = vadd.f32 %v416_v31, %v369_v30  ;;  %v864_v0 = vld [vmem:[#allocation8] sm:$0xff] }
  0xf8   : > { %v710_v19 = vmul.f32 %v2667_v46, %v2188_v18  ;;  %1410 = vmatprep.subr.mxu0 %v881_v32  ;;  %1438 = vmatpush3.msra.mxu1 %v901_v26  ;;  %v2671_v18 = vrot.slane %v2062_v34, %v1967_v8  ;;  %v478_v39 = vadd.f32 %v471_v60, %v424_v57  ;;  %v914_v34 = vld [vmem:[#allocation8 + $0x190] sm:$0xff]  ;;  %v2488_v15 = vstv %s848_s13 }
  0xf9   : > { %v470_v37 = vmul.f32 %v2670_v43, %v2370_v40  ;;  %1411 = vmatpush3.msra.mxu0 %v865_v14  ;;  %1439 = vmatprep.subr.mxu1 %v916_v38  ;;  %v2672_v27 = vrot.slane %v2047_v9, %v2000_v23  ;;  %v2673_v40 = vld [vmem:[#allocation13_spill] sm:$0xff]  ;;  %v913_v9 = vld [vmem:[#allocation8 + $0x188] sm:$0xff] }
  0xfa   : > { %v811_v1 = vmul.f32 %v2671_v18, %v2285_v10  ;;  %825 = vrot.lane.b32.xlu0 %v815_v44, %s1779_s11  ;;  %v756_v31 = vmul.f32 %v739_v6, %v2673_v40  ;;  %1412 = vmatprep.subr.mxu0 %v880_v63  ;;  %v764_v8 = vadd.f32 %v757_v4, %v710_v19  ;;  %v943_v4 = vld [vmem:[#allocation8 + $0x278] sm:$0xff]  ;;  %v940_v40 = vld [vmem:[#allocation8 + $0x260] sm:$0xff] }
  0xfb   : > { %v709_v17 = vmul.f32 %v2672_v27, %v2317_v7  ;;  %490 = vrot.lane.b32.xlu1 %v478_v39, %s1778_s8  ;;  %1440 = vmatpush3.msra.mxu1 %v900_v54  ;;  %v810_v10 = vmul.f32 %v793_v45, %v2366_v62  ;;  %v477_v11 = vadd.f32 %v470_v37, %v423_v3  ;;  %v896_v62 = vld [vmem:[#allocation8 + $0x100] sm:$0xff]  ;;  %v958_v37 = vld [vmem:[#allocation8 + $0x2f0] sm:$0xff] }
  0xfc   : > { %1413 = vmatpush3.msra.mxu0 %v864_v0  ;;  %1441 = vmatprep.subr.mxu1 %v915_v53  ;;  %v818_v23 = vadd.f32 %v811_v1, %v764_v8  ;;  %v942_v54 = vld [vmem:[#allocation8 + $0x270] sm:$0xff]  ;;  %v941_v1 = vld [vmem:[#allocation8 + $0x268] sm:$0xff]  ;;  %v956_v27 = vld [vmem:[#allocation8 + $0x2e0] sm:$0xff] }
  0xfd   : > { %1442 = vmatpush3.msra.mxu1 %v899_v22  ;;  %1452 = vmatprep.subr.mxu0 %v959_v5  ;;  %v763_v7 = vadd.f32 %v756_v31, %v709_v17  ;;  %v955_v22 = vld [vmem:[#allocation8 + $0x2d8] sm:$0xff] }
  0xfe   : > { %488 = vrot.lane.b32.xlu0 %v477_v11, %s1778_s8  ;;  %1443 = vmatprep.subr.mxu1 %v914_v34  ;;  %v975_v5 = vld [vmem:[#allocation8 + $0x378] sm:$0xff] }
  0xff   : > { %831 = vrot.lane.b32.xlu1 %v818_v23, %s1779_s11  ;;  %1444 = vmatpush3.msra.mxu1 %v898_v21  ;;  %v817_v13 = vadd.f32 %v810_v10, %v763_v7  ;;  %v939_v11 = vld [vmem:[#allocation8 + $0x258] sm:$0xff]  ;;  %v954_v23 = vld [vmem:[#allocation8 + $0x2d0] sm:$0xff] }
 0x100   : > { %1445 = vmatprep.subr.mxu1 %v913_v9  ;;  %v974_v9 = vld [vmem:[#allocation8 + $0x370] sm:$0xff] }
 0x101   : > { %1446 = vmatpush3.msra.mxu1 %v897_v25  ;;  %v938_v25 = vld [vmem:[#allocation8 + $0x250] sm:$0xff] }
 0x102   : > { %829 = vrot.lane.b32.xlu0 %v817_v13, %s1779_s11  ;;  %1447 = vmatprep.subr.mxu1 %v912_v50  ;;  %v973_v50 = vld [vmem:[#allocation8 + $0x368] sm:$0xff] }
 0x103   : > { %1448 = vmatpush3.msra.mxu1 %v896_v62  ;;  %v937_v13 = vld [vmem:[#allocation8 + $0x248] sm:$0xff] }
 0x104   : > { %1504 = vmatprep.subr.mxu1 %v1780_v52 }
 0x153   : > { %v483_v35 = vpop.permute.xlu1 %482 }
 0x157   : > { %v822_v58 = vpop.permute.xlu1 %821 }
 0x159   : > { %v824_v55 = vpop.permute.xlu0 %823 }
 0x15a   : > { %v838_v41 = vsel %vm833_vm4, %v822_v58, %v824_v55 }
 0x15b   : > { %v2481_v2 = vpop.permute.xlu1 %819 }
 0x15d   : > { %v481_v61 = vpop.permute.xlu0 %480 }
 0x15e   : > { %v500_v30 = vsel %vm494_vm3, %v481_v61, %v483_v35 }
 0x15f   : > { %v658_v16 = vadd.f32 %v2311_v12, %v500_v30  ;;  %v839_v12 = vsel %vm833_vm4, %v2481_v2, %v822_v58  ;;  %v936_v58 = vld [vmem:[#allocation8 + $0x240] sm:$0xff]  ;;  %v951_v30 = vld [vmem:[#allocation8 + $0x2b8] sm:$0xff] }
 0x161   : > { %v842_v24 = vadd.f32 %v838_v41, %v658_v16  ;;  %v971_v16 = vld [vmem:[#allocation8 + $0x358] sm:$0xff] }
 0x162   : > { %v2490_v59 = vpop.permute.xlu0 %492  ;;  %v935_v41 = vld [vmem:[#allocation8 + $0x238] sm:$0xff] }
 0x163   : > { %v501_v20 = vsel %vm494_vm3, %v2490_v59, %v481_v61  ;;  %v851_v26 = vadd.f32 %v2488_v15, %v842_v24  ;;  %v950_v24 = vld [vmem:[#allocation8 + $0x2b0] sm:$0xff] }
 0x164   : > { %v2492_v60 = vpop.permute.xlu1 %486  ;;  %v657_v32 = vadd.f32 %v2415_v29, %v501_v20  ;;  %v970_v20 = vld [vmem:[#allocation8 + $0x350] sm:$0xff] }
 0x165   : > { %v858_v6 = vmax.f32 %v851_v26, 0.0 }
 0x166   : > { %v841_v45 = vadd.f32 %v839_v12, %v657_v32  ;;  %v934_v32 = vld [vmem:[#allocation8 + $0x230] sm:$0xff]  ;;  %v949_v12 = vld [vmem:[#allocation8 + $0x2a8] sm:$0xff] }
 0x167   : > { %v485_v49 = vpop.permute.xlu0 %484  ;;  %1047 = vmatprep.mubr.f32.mxu0 %v858_v6 }
 0x168   : > { %v2502_v14 = vpop.permute.xlu1 %827  ;;  %v498_v38 = vsel %vm494_vm3, %v485_v49, %v2492_v60  ;;  %v499_v46 = vsel %vm494_vm3, %v483_v35, %v485_v49  ;;  %v850_v29 = vadd.f32 %v2488_v15, %v841_v45  ;;  %v952_v35 = vld [vmem:[#allocation8 + $0x2c0] sm:$0xff]  ;;  %v969_v45 = vld [vmem:[#allocation8 + $0x348] sm:$0xff] }
 0x169   : > { %v659_v19 = vadd.f32 %v2419_v56, %v499_v46  ;;  %v660_v42 = vadd.f32 %v2433_v48, %v498_v38  ;;  %v957_v56 = vld [vmem:[#allocation8 + $0x2e8] sm:$0xff]  ;;  %v948_v38 = vld [vmem:[#allocation8 + $0x2a0] sm:$0xff] }
 0x16a   : > { %v857_v36 = vmax.f32 %v850_v29, 0.0  ;;  %v933_v49 = vld [vmem:[#allocation8 + $0x228] sm:$0xff]  ;;  %v932_v29 = vld [vmem:[#allocation8 + $0x220] sm:$0xff] }
 0x16c   : > { %v826_v57 = vpop.permute.xlu0 %825  ;;  %1048 = vmatmul.mubr.f32.vlgmr.msra.gmra.mxu0 %v857_v36  ;;  %v931_v36 = vld [vmem:[#allocation8 + $0x218] sm:$0xff] }
 0x16d   : > { %v836_v63 = vsel %vm833_vm4, %v826_v57, %v2502_v14  ;;  %v837_v43 = vsel %vm833_vm4, %v824_v55, %v826_v57  ;;  %v2517_v44 = vpop.permute.xlu1 %490  ;;  %1453 = vmatpush3.msra.mxu0 %v943_v4  ;;  %v972_v55 = vld [vmem:[#allocation8 + $0x360] sm:$0xff]  ;;  %v967_v57 = vld [vmem:[#allocation8 + $0x338] sm:$0xff]  ;;  %v930_v4 = vld [vmem:[#allocation8 + $0x210] sm:$0xff] }
 0x16e   : > { %v843_v3 = vadd.f32 %v837_v43, %v659_v19  ;;  %v844_v18 = vadd.f32 %v836_v63, %v660_v42  ;;  %1454 = vmatprep.subr.mxu0 %v958_v37  ;;  %v947_v19 = vld [vmem:[#allocation8 + $0x298] sm:$0xff]  ;;  %v495_v63 = vsel %vm494_vm3, %v2517_v44, %v2490_v59  ;;  %v945_v43 = vld [vmem:[#allocation8 + $0x288] sm:$0xff] }
 0x16f   : > { %1455 = vmatpush3.msra.mxu0 %v942_v54  ;;  %v929_v54 = vld [vmem:[#allocation8 + $0x208] sm:$0xff]  ;;  %v663_v59 = vadd.f32 %v2437_v33, %v495_v63 }
 0x170   : > { %v489_v48 = vpop.permute.xlu0 %488  ;;  %v853_v39 = vadd.f32 %v2488_v15, %v844_v18  ;;  %v852_v0 = vadd.f32 %v2488_v15, %v843_v3  ;;  %1456 = vmatprep.subr.mxu0 %v957_v56  ;;  %v965_v3 = vld [vmem:[#allocation8 + $0x328] sm:$0xff]  ;;  %v944_v56 = vld [vmem:[#allocation8 + $0x280] sm:$0xff] }
 0x171   : > { %v496_v53 = vsel %vm494_vm3, %v489_v48, %v2517_v44  ;;  %1457 = vmatpush3.msra.mxu0 %v941_v1  ;;  %v2524_v8 = vpop.permute.xlu1 %831  ;;  %v497_v26 = vsel %vm494_vm3, %v2492_v60, %v489_v48  ;;  %v968_v60 = vld [vmem:[#allocation8 + $0x340] sm:$0xff] }
 0x172   : > { %v860_v17 = vmax.f32 %v853_v39, 0.0  ;;  %v859_v31 = vmax.f32 %v852_v0, 0.0  ;;  %v662_v34 = vadd.f32 %v2445_v47, %v496_v53  ;;  %1458 = vmatprep.subr.mxu0 %v956_v27  ;;  %v953_v47 = vld [vmem:[#allocation8 + $0x2c8] sm:$0xff]  ;;  %v661_v46 = vadd.f32 %v2439_v28, %v497_v26  ;;  %v966_v28 = vld [vmem:[#allocation8 + $0x330] sm:$0xff]  ;;  %v964_v44 = vld [vmem:[#allocation8 + $0x320] sm:$0xff] }
 0x173   : > { %1459 = vmatpush3.msra.mxu0 %v940_v40  ;;  %v840_v18 = vsel %vm833_vm4, %v2524_v8, %v2481_v2  ;;  %v928_v48 = vld [vmem:[#allocation8 + $0x200] sm:$0xff]  ;;  %v963_v0 = vld [vmem:[#allocation8 + $0x318] sm:$0xff]  ;;  %v961_v2 = vld [vmem:[#allocation8 + $0x308] sm:$0xff] }
 0x174   : > { %1117 = vmatprep.mubr.f32.mxu1 %v860_v17  ;;  %v830_v10 = vpop.permute.xlu0 %829  ;;  %1460 = vmatprep.subr.mxu0 %v955_v22  ;;  %v847_v1 = vadd.f32 %v840_v18, %v663_v59  ;;  %v960_v53 = vld [vmem:[#allocation8 + $0x300] sm:$0xff] }
 0x175   : > { %v834_v21 = vsel %vm833_vm4, %v830_v10, %v2524_v8  ;;  %1118 = vmatmul.mubr.f32.vlgmr.msra.gmra.mxu1 %v859_v31  ;;  %1461 = vmatpush3.msra.mxu0 %v939_v11  ;;  %v835_v6 = vsel %vm833_vm4, %v2502_v14, %v830_v10  ;;  %v946_v14 = vld [vmem:[#allocation8 + $0x290] sm:$0xff] }
 0x176   : > { %v846_v7 = vadd.f32 %v834_v21, %v662_v34  ;;  %1505 = vmatpush3.msra.mxu1 %v975_v5  ;;  %1462 = vmatprep.subr.mxu0 %v954_v23  ;;  %v845_v42 = vadd.f32 %v835_v6, %v661_v46  ;;  %v856_v33 = vadd.f32 %v2488_v15, %v847_v1  ;;  %v1377_v5 = vld [vmem:[%s2614_s4] ss:$0 sm:$0xff] }
 0x177   : > { %1506 = vmatprep.subr.mxu1 %v1780_v52  ;;  %1463 = vmatpush3.msra.mxu0 %v938_v25 }
 0x178   : > { %1507 = vmatpush3.msra.mxu1 %v974_v9  ;;  %v855_v62 = vadd.f32 %v2488_v15, %v846_v7  ;;  %1464 = vmatprep.subr.mxu0 %v953_v47  ;;  %v854_v37 = vadd.f32 %v2488_v15, %v845_v42  ;;  %v863_v27 = vmax.f32 %v856_v33, 0.0 }
 0x179   : > { %1508 = vmatprep.subr.mxu1 %v1780_v52  ;;  %1465 = vmatpush3.msra.mxu0 %v937_v13 }
 0x17a   : > { %1509 = vmatpush3.msra.mxu1 %v973_v50  ;;  %v862_v61 = vmax.f32 %v855_v62, 0.0  ;;  %1466 = vmatprep.subr.mxu0 %v952_v35  ;;  %v861_v39 = vmax.f32 %v854_v37, 0.0 }
 0x17b   : > { %1510 = vmatprep.subr.mxu1 %v1780_v52  ;;  %1467 = vmatpush3.msra.mxu0 %v936_v58 }
 0x17c   : > { %1511 = vmatpush3.msra.mxu1 %v972_v55  ;;  %1187 = vmatprep.mubr.f32.mxu0 %v862_v61 }
 0x17d   : > { %1512 = vmatprep.subr.mxu1 %v1780_v52  ;;  %1468 = vmatprep.subr.mxu0 %v951_v30 }
 0x17e   : > { %1513 = vmatpush3.msra.mxu1 %v971_v16  ;;  %1469 = vmatpush3.msra.mxu0 %v935_v41 }
 0x17f   : > { %1514 = vmatprep.subr.mxu1 %v1780_v52  ;;  %1470 = vmatprep.subr.mxu0 %v950_v24 }
 0x180   : > { %1515 = vmatpush3.msra.mxu1 %v970_v20  ;;  %1471 = vmatpush3.msra.mxu0 %v934_v32 }
 0x181   : > { %1516 = vmatprep.subr.mxu1 %v1780_v52  ;;  %1472 = vmatprep.subr.mxu0 %v949_v12 }
 0x182   : > { %1517 = vmatpush3.msra.mxu1 %v969_v45  ;;  %1473 = vmatpush3.msra.mxu0 %v933_v49 }
 0x183   : > { %1518 = vmatprep.subr.mxu1 %v1780_v52  ;;  %1474 = vmatprep.subr.mxu0 %v948_v38 }
 0x184   : > { %1519 = vmatpush3.msra.mxu1 %v968_v60  ;;  %1475 = vmatpush3.msra.mxu0 %v932_v29 }
 0x185   : > { %1520 = vmatprep.subr.mxu1 %v1780_v52  ;;  %1476 = vmatprep.subr.mxu0 %v947_v19 }
 0x186   : > { %1521 = vmatpush3.msra.mxu1 %v967_v57  ;;  %1477 = vmatpush3.msra.mxu0 %v931_v36 }
 0x187   : > { %1522 = vmatprep.subr.mxu1 %v1780_v52  ;;  %1478 = vmatprep.subr.mxu0 %v946_v14 }
 0x188   : > { %1523 = vmatpush3.msra.mxu1 %v966_v28  ;;  %1479 = vmatpush3.msra.mxu0 %v930_v4 }
 0x189   : > { %1524 = vmatprep.subr.mxu1 %v1780_v52  ;;  %1480 = vmatprep.subr.mxu0 %v945_v43 }
 0x18a   : > { %1525 = vmatpush3.msra.mxu1 %v965_v3  ;;  %1481 = vmatpush3.msra.mxu0 %v929_v54 }
 0x18b   : > { %1526 = vmatprep.subr.mxu1 %v1780_v52  ;;  %1482 = vmatprep.subr.mxu0 %v944_v56 }
 0x18c   : > { %1527 = vmatpush3.msra.mxu1 %v964_v44  ;;  %1483 = vmatpush3.msra.mxu0 %v928_v48 }
 0x18d   : > { %1528 = vmatprep.subr.mxu1 %v1780_v52  ;;  %1188 = vmatmul.mubr.f32.vlgmr.msra.gmra.mxu0 %v861_v39 }
 0x18e   : > { %1529 = vmatpush3.msra.mxu1 %v963_v0  ;;  %1536 = vmatprep.mubr.msk.f32.mxu1 %vm1781_vm5, %v1780_v52 }
 0x18f   : > { %1530 = vmatprep.subr.mxu1 %v1780_v52 }
 0x190   : > { %1531 = vmatpush3.msra.mxu1 %v962_v51 }
 0x191   : > { %1532 = vmatprep.subr.mxu1 %v1780_v52 }
 0x192   : > { %1533 = vmatpush3.msra.mxu1 %v961_v2 }
 0x193   : > { %1534 = vmatprep.subr.mxu1 %v1780_v52 }
 0x194   : > { %1535 = vmatpush3.msra.mxu1 %v960_v53 }
 0x195   : > { %1537 = vmatmul.mubr.f32.vlgmr.msra.gmra.mxu1 %v863_v27 }
 0x22c   : > { %v1414_v17 = vpop.f32.mrf.mxu0 }
 0x22e   : > { %v1415_v31 = vpop.f32.mrf.mxu0 }
 0x22f   : > { %v1416_v15 = vadd.f32 %v1415_v31, %v1414_v17 }
 0x231   : > { %v1050_v10 = vadd.f32 %v1416_v15, %v1377_v5 }
 0x235   : > { %v1449_v40 = vpop.f32.mrf.mxu1 }
 0x237   : > { %v1450_v22 = vpop.f32.mrf.mxu1 }
 0x238   : > { %v1451_v8 = vadd.f32 %v1450_v22, %v1449_v40 }
 0x23a   : > { %v1120_v52 = vadd.f32 %v1451_v8, %v1050_v10 }
 0x24d   : > { %v1484_v34 = vpop.f32.mrf.mxu0 }
 0x24f   : > { %v1485_v11 = vpop.f32.mrf.mxu0 }
 0x250   : > { %v1486_v21 = vadd.f32 %v1485_v11, %v1484_v34 }
 0x252   : > { %v1190_v23 = vadd.f32 %v1486_v21, %v1120_v52 }
 0x255   : > { %v1259_v9 = vpop.f32.mrf.mxu1 }
 0x256   : > { %v1260_v7 = vadd.f32 %v1259_v9, %v1190_v23 }
 0x257   : > { %v1538_v25 = vpop.f32.mrf.mxu1 }
 0x258   : > { %1263 = vst [vmem:[%s270_s6] sm:$0xff] %v1260_v7 }
 0x259   : > { %1712 = shalt.err (!%p1709_p9)
}
 0x25a   : > { %s1713_s8 = scalar_lea.hbm %s2573_s15, 128  ;;  %s1717_s13 = scalar_lea.hbm %s2615_s5, 256 }
 0x25b   : > { %p1714_p13 = scmp.ne.s32.totalorder %s2573_s15, %s1713_s8  ;;  %p1718_p0 = scmp.lt.s32.totalorder %s2573_s15, %s2615_s5 }
 0x25c   : > { %p1719_p4 = scmp.lt.s32.totalorder %s1717_s13, %s1713_s8 }
 0x25d   : > { %p1715_p5 = pnand %p1714_p13, %p2674_p11 }
 0x25e   : > { %p1720_p8 = por %p1719_p4, %p1718_p0 }
 0x25f   : > { %p1716_p10 = pneg %p1715_p5 }
 0x261   : > { %p1721_p7 = pnand %p1720_p8, %p1716_p10 }
 0x263   : > { %1724 = shalt.err (!%p1721_p7)
}
 0x264   : > { %1552 = dma.vmem_to_hbm [thread:$0]  (%p2674_p11), %s1279_s30, 128, %s2573_s15, %s1265_s16  }
 0x265 PF: > { %s1290_s24 = sand.u32 1, %s1755_s20   ;;  %p2675_p1 = scmp.ne.s32.totalorder %s2623_s26, 0 }
 0x266   : > { %p2676_p2 = scmp.ge.s32.totalorder %s1767_s23, 2  ;;  %s1291_s7 = scalar_lea.sflag [#allocation5], %s1290_s24 }
 0x268   : > { %p1566_p6 = pnand %p2676_p2, %p2675_p1 }
 0x26a   : > { %p1567_p12 = pneg %p1566_p6 }
 0x26c   : > { %1750 = dma.done.wait (%p1567_p12), %s1291_s7, 128  }
 0x26d   : > { %1752 = vsyncadd (%p1567_p12), %s1291_s7, 4294967168  ;;  %p20_p3 = scmp.ge.s32.totalorder %s1888_s18, 4   ;;  %s2677_s20 = smov %s1759_s21 }
 0x26e   : > { %s2678_s21 = smov %s1763_s22  ;;  %s2679_s22 = smov %s1897_s28 }
 0x26f   : > { %s2680_s23 = smov %s1888_s18  ;;  %22 = sbr.rel (!%p20_p3) target bundleno = 8 (0x8), region = 101 }
 0x274   :  { %1296 = vsyncpa [#allocation4], 1 }
 0x275   :  { %1298 = vsyncpa [#allocation4 + $0x1], 1 }
 0x276   :  { %1299 = vsyncpa [#allocation7], 1 }
 0x277   :  { %1300 = vsyncpa [#allocation5], 1 }
 0x278   :  { %1302 = vsyncpa [#allocation5 + $0x1], 1 }

</bundles_post_ra>
